<compile_context>
chip_gen: v5e
topology: v5e:2x2
jax: 0.10.0
libtpu: 0.0.40
codegen_flags: <defaults>
</compile_context>

<pallas_src>
import functools

import jax
import jax.numpy as jnp
from jax.experimental import pallas as pl
from jax.experimental.pallas import tpu as pltpu


def _cdiv(a, b):
    return -(-a // b)


def _round_up(x, m):
    return ((x + m - 1) // m) * m


def _mlp_kernel(h_ref, w1_ref, b1_ref, w2_ref, b2_ref, o_ref):
    """Fused Linear -> ReLU -> Linear on one (TB, inputs_dim) batch tile.

    w1/b1/w2/b2 are full-array blocks with constant index_maps, so they stay
    resident in VMEM across all grid steps (single parameter DMA).
    """
    h = h_ref[...]                                                   # (TB, IN) f32
    z = jnp.dot(h, w1_ref[...],
                preferred_element_type=jnp.float32) + b1_ref[...]    # (TB, EMB)
    z = jnp.maximum(z, 0.0)                                          # ReLU
    y = jnp.dot(z, w2_ref[...],
                preferred_element_type=jnp.float32) + b2_ref[...]    # (TB, OUT)
    o_ref[...] = y.astype(o_ref.dtype)


@functools.partial(jax.jit, static_argnames=("tb", "min_pallas_batch"))
def simple_operator_forward(x, h, w1, b1, w2, b2, *, tb=1024, min_pallas_batch=128):
    """Pallas implementation of SimpleOperatorModule.forward(x, h).

    x is unused (matches the PyTorch module). h: (B, inputs_dim).
    w1: (inputs_dim, embeddings_dim), b1: (1, embeddings_dim)
    w2: (embeddings_dim, outputs_dim), b2: (1, outputs_dim)
    """
    del x  # unused by the reference module's forward
    B, inputs_dim = h.shape
    embeddings_dim = w1.shape[1]
    outputs_dim = w2.shape[1]

    # Tiny-batch fast path: at these sizes the whole op is <1 us of real work
    # and pallas_call launch / per-step overhead dominates — let XLA fuse it.
    if B < min_pallas_batch:
        z = jnp.maximum(
            jnp.dot(h, w1, preferred_element_type=jnp.float32) + b1, 0.0)
        y = jnp.dot(z, w2, preferred_element_type=jnp.float32) + b2
        return y.astype(h.dtype)

    # Batch tile: multiple of 8 (f32 sublane). Clamp so the grid has >= 2
    # steps whenever B allows, so the "parallel" axis actually splits across
    # v7x's two TensorCores (no-op on v5e/v6e).
    tb = max(8, min(tb, _round_up(_cdiv(B, 2), 8)))
    grid = (_cdiv(B, tb),)

    # VMEM budget: double-buffered h/out tiles + (revisited, double-buffered)
    # param blocks + the (tb, emb) intermediate; 2x headroom, capped well
    # under v7x's 64 MiB physical VMEM.
    itemsize = 4
    h_tile = tb * inputs_dim * itemsize
    o_tile = tb * outputs_dim * itemsize
    z_tile = tb * embeddings_dim * itemsize
    param_bytes = (w1.size + b1.size + w2.size + b2.size) * itemsize
    vmem_needed = 2 * (h_tile + o_tile) + 2 * param_bytes + z_tile
    vmem_limit = int(min(max(2 * vmem_needed, 16 * 1024 * 1024), 48 * 1024 * 1024))

    flops = 2 * B * (inputs_dim * embeddings_dim + embeddings_dim * outputs_dim)
    bytes_accessed = itemsize * (h.size + int(param_bytes // itemsize)
                                 + B * outputs_dim)

    # NOTE: if embeddings_dim/outputs_dim ever get large, consider
    # pipeline_mode=pl.Buffered(1) on the resident param specs (halves their
    # VMEM footprint on v7x). Not needed at these sizes.
    out = pl.pallas_call(
        _mlp_kernel,
        out_shape=jax.ShapeDtypeStruct((B, outputs_dim), h.dtype),
        grid_spec=pltpu.PrefetchScalarGridSpec(
            num_scalar_prefetch=0,
            grid=grid,
            in_specs=[
                pl.BlockSpec((tb, inputs_dim), lambda i: (i, 0)),              # h tile
                pl.BlockSpec((inputs_dim, embeddings_dim), lambda i: (0, 0)),  # w1 (resident)
                pl.BlockSpec((1, embeddings_dim), lambda i: (0, 0)),           # b1 (resident)
                pl.BlockSpec((embeddings_dim, outputs_dim), lambda i: (0, 0)), # w2 (resident)
                pl.BlockSpec((1, outputs_dim), lambda i: (0, 0)),              # b2 (resident)
            ],
            out_specs=pl.BlockSpec((tb, outputs_dim), lambda i: (i, 0)),
        ),
        compiler_params=pltpu.CompilerParams(
            dimension_semantics=("parallel",),   # megacore split on v7x
            vmem_limit_bytes=vmem_limit,
        ),
        cost_estimate=pl.CostEstimate(
            flops=flops, transcendentals=0, bytes_accessed=bytes_accessed),
    )(h, w1, b1, w2, b2)

    return out


def init_params(key, inputs_dim, embeddings_dim, outputs_dim, dtype=jnp.float32):
    """Deterministic synthetic parameter init (PyTorch-Linear-like uniform)."""
    k1, k2, k3, k4 = jax.random.split(key, 4)
    bound1 = 1.0 / jnp.sqrt(inputs_dim)
    bound2 = 1.0 / jnp.sqrt(embeddings_dim)
    w1 = jax.random.uniform(k1, (inputs_dim, embeddings_dim), dtype, -bound1, bound1)
    b1 = jax.random.uniform(k2, (1, embeddings_dim), dtype, -bound1, bound1)
    w2 = jax.random.uniform(k3, (embeddings_dim, outputs_dim), dtype, -bound2, bound2)
    b2 = jax.random.uniform(k4, (1, outputs_dim), dtype, -bound2, bound2)
    return w1, b1, w2, b2


if __name__ == "__main__":
    inputs_dim = 32
    embeddings_dim = 8
    outputs_dim = 16

    key = jax.random.PRNGKey(0)
    kx, kh, kh2, kp = jax.random.split(key, 4)
    w1, b1, w2, b2 = init_params(kp, inputs_dim, embeddings_dim, outputs_dim)

    def reference(hh):
        z = jnp.maximum(jnp.dot(hh, w1) + b1, 0.0)
        return jnp.dot(z, w2) + b2

    # Tolerance covers MXU f32 pass / accumulation-order differences between
    # the Mosaic matmul and the XLA reference; real bugs are O(0.1-1) off.
    TOL = 2e-2

    # 1) Small batch (spec default size). Force the Pallas path so the kernel
    #    itself is exercised (the production fast path would route this to XLA).
    batch = 8
    x = jax.random.normal(kx, (batch, inputs_dim), jnp.float32)   # unused by forward
    h = jax.random.normal(kh, (batch, inputs_dim), jnp.float32)
    y = jax.block_until_ready(
        simple_operator_forward(x, h, w1, b1, w2, b2, min_pallas_batch=0))
    assert y.shape == (batch, outputs_dim)
    y_ref = reference(h)
    assert jnp.allclose(y, y_ref, atol=TOL, rtol=TOL), (
        f"max abs err = {jnp.max(jnp.abs(y - y_ref))}")

    # 2) Larger batch not divisible by the tile: exercises the multi-step
    #    "parallel" grid and the masked edge block (no wrapper-side padding).
    batch2 = 200
    h2 = jax.random.normal(kh2, (batch2, inputs_dim), jnp.float32)
    y2 = jax.block_until_ready(
        simple_operator_forward(h2, h2, w1, b1, w2, b2, min_pallas_batch=0))
    assert y2.shape == (batch2, outputs_dim)
    y2_ref = reference(h2)
    assert jnp.allclose(y2, y2_ref, atol=TOL, rtol=TOL), (
        f"max abs err = {jnp.max(jnp.abs(y2 - y2_ref))}")

    print("KERNEL_OK")
</pallas_src>

<mosaic_0001>
module attributes {stable_mosaic.version = 11 : i64} {
  func.func @_mlp_kernel(%arg0: i32, %arg1: memref<8x32xf32, #tpu.memory_space<vmem>>, %arg2: memref<32x8xf32, #tpu.memory_space<vmem>>, %arg3: memref<1x8xf32, #tpu.memory_space<vmem>>, %arg4: memref<8x16xf32, #tpu.memory_space<vmem>>, %arg5: memref<1x16xf32, #tpu.memory_space<vmem>>, %arg6: memref<8x16xf32, #tpu.memory_space<vmem>>) attributes {dimension_semantics = [#tpu.dimension_semantics<parallel>], iteration_bounds = array<i64: 1>, scalar_prefetch = 0 : i64, scratch_operands = 0 : i64, tpu.core_type = #tpu.core_type<tc>, window_params = [{transform_indices = @transform_0, window_bounds = array<i64: 8, 32>}, {pipeline_mode = #tpu.pipeline_mode<synchronous>, transform_indices = @transform_1, window_bounds = array<i64: 32, 8>}, {pipeline_mode = #tpu.pipeline_mode<synchronous>, transform_indices = @transform_2, window_bounds = array<i64: 1, 8>}, {pipeline_mode = #tpu.pipeline_mode<synchronous>, transform_indices = @transform_3, window_bounds = array<i64: 8, 16>}, {pipeline_mode = #tpu.pipeline_mode<synchronous>, transform_indices = @transform_4, window_bounds = array<i64: 1, 16>}, {transform_indices = @transform_5, window_bounds = array<i64: 8, 16>}]} {
    %c0 = arith.constant 0 : index
    %c0_0 = arith.constant 0 : index
    %0 = vector.load %arg1[%c0, %c0_0] : memref<8x32xf32, #tpu.memory_space<vmem>>, vector<8x32xf32>
    %c0_1 = arith.constant 0 : index
    %c0_2 = arith.constant 0 : index
    %1 = vector.load %arg2[%c0_1, %c0_2] : memref<32x8xf32, #tpu.memory_space<vmem>>, vector<32x8xf32>
    %cst = arith.constant dense<0.000000e+00> : vector<8x8xf32>
    %2 = tpu.matmul %0, %1, %cst {dimension_numbers = #tpu.dot_dimension_numbers<[1], [0], [0], [1], [0, 0, 1, 1], [], []>} : vector<8x32xf32>, vector<32x8xf32>, vector<8x8xf32> -> vector<8x8xf32>
    %c0_3 = arith.constant 0 : index
    %c0_4 = arith.constant 0 : index
    %3 = vector.load %arg3[%c0_3, %c0_4] : memref<1x8xf32, #tpu.memory_space<vmem>>, vector<1x8xf32>
    %4 = vector.broadcast %3 : vector<1x8xf32> to vector<8x8xf32>
    %5 = arith.addf %2, %4 : vector<8x8xf32>
    %cst_5 = arith.constant 0.000000e+00 : f32
    %6 = vector.broadcast %cst_5 : f32 to vector<8x8xf32>
    %7 = arith.maximumf %5, %6 : vector<8x8xf32>
    %c0_6 = arith.constant 0 : index
    %c0_7 = arith.constant 0 : index
    %8 = vector.load %arg4[%c0_6, %c0_7] : memref<8x16xf32, #tpu.memory_space<vmem>>, vector<8x16xf32>
    %cst_8 = arith.constant dense<0.000000e+00> : vector<8x16xf32>
    %9 = tpu.matmul %7, %8, %cst_8 {dimension_numbers = #tpu.dot_dimension_numbers<[1], [0], [0], [1], [0, 0, 1, 1], [], []>} : vector<8x8xf32>, vector<8x16xf32>, vector<8x16xf32> -> vector<8x16xf32>
    %c0_9 = arith.constant 0 : index
    %c0_10 = arith.constant 0 : index
    %10 = vector.load %arg5[%c0_9, %c0_10] : memref<1x16xf32, #tpu.memory_space<vmem>>, vector<1x16xf32>
    %11 = vector.broadcast %10 : vector<1x16xf32> to vector<8x16xf32>
    %12 = arith.addf %9, %11 : vector<8x16xf32>
    %c0_11 = arith.constant 0 : index
    %c0_12 = arith.constant 0 : index
    %13 = vector.load %arg6[%c0_11, %c0_12] : memref<8x16xf32, #tpu.memory_space<vmem>>, vector<8x16xf32>
    tpu.vector_store %arg6[%c0_11, %c0_12], %12 {strides = array<i32>} : memref<8x16xf32, #tpu.memory_space<vmem>>, vector<8x16xf32>,
    return
  }
  func.func @transform_0(%arg0: i32) -> (i32, i32) {
    %c0_i32 = arith.constant 0 : i32
    %c0_i32_0 = arith.constant 0 : i32
    return %arg0, %c0_i32 : i32, i32
  }
  func.func @transform_1(%arg0: i32) -> (i32, i32) {
    %c0_i32 = arith.constant 0 : i32
    %c0_i32_0 = arith.constant 0 : i32
    %c0_i32_1 = arith.constant 0 : i32
    return %c0_i32, %c0_i32_0 : i32, i32
  }
  func.func @transform_2(%arg0: i32) -> (i32, i32) {
    %c0_i32 = arith.constant 0 : i32
    %c0_i32_0 = arith.constant 0 : i32
    %c0_i32_1 = arith.constant 0 : i32
    return %c0_i32, %c0_i32_0 : i32, i32
  }
  func.func @transform_3(%arg0: i32) -> (i32, i32) {
    %c0_i32 = arith.constant 0 : i32
    %c0_i32_0 = arith.constant 0 : i32
    %c0_i32_1 = arith.constant 0 : i32
    return %c0_i32, %c0_i32_0 : i32, i32
  }
  func.func @transform_4(%arg0: i32) -> (i32, i32) {
    %c0_i32 = arith.constant 0 : i32
    %c0_i32_0 = arith.constant 0 : i32
    %c0_i32_1 = arith.constant 0 : i32
    return %c0_i32, %c0_i32_0 : i32, i32
  }
  func.func @transform_5(%arg0: i32) -> (i32, i32) {
    %c0_i32 = arith.constant 0 : i32
    %c0_i32_0 = arith.constant 0 : i32
    return %arg0, %c0_i32 : i32, i32
  }
}

</mosaic_0001>

<bundles_post_ra>
// kernel: simple_operator_forward.1
= control target key start
LH: loop header
LB: loop body
LE: loop exit
PB: predicated region body
PF: predicated region fallthrough
CT: control target
= control target key end

     0   :  { %s191_s0 = inlined_call_operand.vmem [shape: f32[8,32], index: 0, kind: input, shape index: {}]   ;;  %s192_s1 = inlined_call_operand.vmem [shape: f32[32,8], index: 1, kind: input, shape index: {}]   ;;  %s193_s2 = inlined_call_operand.vmem [shape: f32[1,8], index: 2, kind: input, shape index: {}]   ;;  %s194_s3 = inlined_call_operand.vmem [shape: f32[8,16], index: 3, kind: input, shape index: {}]   ;;  %s195_s4 = inlined_call_operand.vmem [shape: f32[1,16], index: 4, kind: input, shape index: {}]   ;;  %s196_s5 = inlined_call_operand.hbm [shape: f32[8,16], index: 5, kind: output, shape index: {}]  }
   0x1   :  { %v25_v0 = vld [vmem:[%s192_s1 + $0x18] sm:$0xff]  ;;  %v24_v1 = vld [vmem:[%s192_s1 + $0x10] sm:$0xff]  ;;  %v23_v2 = vld [vmem:[%s192_s1 + $0x8] sm:$0xff] }
   0x2   :  { %46 = vmatpush.msra.mxu0 %v25_v0 }
   0x3   :  { %10 = vsyncpa [#allocation3], 0  ;;  %v22_v3 = vld [vmem:[%s192_s1] sm:$0xff]  ;;  %vm30_vm0 = vcmask 261120   ;;  %vm60_vm1 = vcmask 64512   ;;  %vm84_vm2 = vcmask 130048  }
   0x4   :  { %47 = vmatpush.msra.mxu0 %v24_v1  ;;  %v21_v4 = vld [vmem:[%s191_s0] sm:$0xff]  ;;  %s133_s0 = smov [#allocation2]  }
   0x5   :  { %v55_v5 = vld [vmem:[%s194_s3] sm:$0xff]  ;;  %s91_s8 = sshll.u32 %s133_s0, 4  ;;  %s93_s3 = sshll.u32 %s196_s5, 4  ;;  %s92_s8 = int_to_ptr.vmem [resolvable:$true] %s91_s8  ;;  %s94_s3 = int_to_ptr.hbm [resolvable:$true] %s93_s3 }
   0x6   :  { %48 = vmatpush.msra.mxu0 %v23_v2  ;;  %79 = vmatpush.msra.mxu1 %v55_v5  ;;  %v105_v6 = vld [vmem:[%s193_s2] ss:$0 sm:$0xff] }
   0x7   :  { %v106_v10 = vld [vmem:[%s195_s4] ss:$0 sm:$0xff] }
   0x8   :  { %49 = vmatpush.msra.mxu0 %v22_v3 }
   0x9   :  { %102 = vmatmul.msk.f32.vlgmr.msra.gmra.mxu0 %vm30_vm0, %v21_v4 }
  0x86   :  { %v51_v7 = vpop.f32.mrf.mxu0 }
  0x87   :  { %v52_v8 = vadd.f32 %v105_v6, %v51_v7 }
  0x89   :  { %v54_v9 = vmax.f32 %v52_v8, 0.0 }
  0x8b   :  { %103 = vmatmul.msk.f32.vlgmr.msra.gmra.mxu1 %vm60_vm1, %v54_v9 }
 0x108   :  { %v81_v11 = vpop.f32.mrf.mxu1 }
 0x109   :  { %v82_v12 = vadd.f32 %v106_v10, %v81_v11 }
 0x10b   :  { %85 = vst.msk [vmem:[#allocation2] sm:$0xff] %vm84_vm2, %v82_v12 }
 0x10c   :  { %96 = dma.vmem_to_hbm [thread:$0]  %s92_s8, 128, %s94_s3, [#allocation3]  }
 0x10d   :  { %131 = dma.done.wait [#allocation3], 128  }
 0x10e   :  { %132 = vsyncadd [#allocation3], 4294967168 }
 0x10f   :  { %101 = vsyncpa [#allocation3], 1 }

</bundles_post_ra>
